<compile_context>
chip_gen: v6e
topology: v6e:2x2x1
jax: 0.10.0
libtpu: 0.0.40
codegen_flags: <defaults>
</compile_context>

<pallas_src>
import functools
import math

import jax
import jax.numpy as jnp
from jax.experimental import pallas as pl
from jax.experimental.pallas import tpu as pltpu


# ----------------------------- Pallas kernel --------------------------------

def _moe_grouped_kernel(gid_ref, valid_ref, x_ref, w13_ref, w2_ref, rw_ref,
                        out_ref, acc_ref):
    """grid = (assignment_tile i, ffn_tile f).

    Every row tile i holds tokens routed to exactly ONE expert (gid_ref[i]);
    the weight index_maps already selected that expert's blocks.  The f axis is
    the FFN reduction; the (tm, H) output tile stays resident in the f32 VMEM
    scratch and is stored once on the last f step.
    """
    i = pl.program_id(0)
    f = pl.program_id(1)
    nf = pl.num_programs(1)

    @pl.when(f == 0)
    def _():
        acc_ref[...] = jnp.zeros_like(acc_ref)

    # Tiles past the last routed assignment carry no tokens: skip all MXU/VPU
    # work (their output stays exactly zero; their DMA was already suppressed
    # by the index_maps).
    @pl.when(valid_ref[i] > 0)
    def _():
        x = x_ref[...]                                            # (tm, H) bf16
        h1 = jnp.dot(x, w13_ref[0], preferred_element_type=jnp.float32)
        hg = jnp.dot(x, w13_ref[1], preferred_element_type=jnp.float32)
        # Fold the per-row routing weight into h before the down-projection:
        # tm*tf scaling work instead of tm*H, and the accumulation below stays
        # a plain matmul-accumulate.
        h = (jax.nn.silu(h1) * hg * rw_ref[...]).astype(w2_ref.dtype)
        acc_ref[...] += jnp.dot(h, w2_ref[...],
                                preferred_element_type=jnp.float32)

    @pl.when(f == nf - 1)
    def _():
        out_ref[...] = acc_ref[...].astype(out_ref.dtype)


# ----------------------------- tile / VMEM heuristics ------------------------

def _round_up(x, m):
    return ((x + m - 1) // m) * m


def _device_defaults():
    """(tm_target, tf_target, tm_granule, vmem_cap_bytes) per TPU generation."""
    kind = ""
    try:
        kind = jax.devices()[0].device_kind.lower()
    except Exception:
        pass
    try:
        vmem = int(pltpu.get_tpu_info().vmem_capacity_bytes)
    except Exception:
        vmem = 64 << 20
    if "v5 lite" in kind or "v5e" in kind or "v5litepod" in kind:
        # v5e: roughly MXU-bound near tm~256; larger tiles only add VMEM use.
        return 256, 512, 128, int(vmem * 3 // 4)
    if vmem <= (80 << 20):
        # v7x-sized VMEM (64 MiB/TC): trade tf down, spend VMEM on tm.
        return 512, 256, 256, min(48 << 20, int(vmem * 3 // 4))
    # v6e (128 MiB): tm large enough to hide weight streaming behind MACs.
    return 1024, 512, 256, int(vmem * 3 // 4)


def _pick_tf(F, target):
    """Largest multiple of 128 <= target that divides F, else full F."""
    if F <= target or F % 128 != 0:
        return F
    t = min((target // 128) * 128, F)
    while t > 128 and F % t != 0:
        t -= 128
    return t if (t >= 128 and F % t == 0) else F


def _pick_tm(A, target, granule):
    """Token-tile size: big (to hide weight DMA) but not far beyond A."""
    tm = min(target, _round_up(max(A, 1), granule))
    tm = max((tm // granule) * granule, granule)
    if A <= granule // 2:                 # decode-sized batches: don't over-pad
        tm = max(_round_up(A, 16), 16)
    return tm


# ----------------------------- grouped MoE wrapper ---------------------------

def moe_grouped_pallas(x_flat, w13, w2, topk_idx, topk_w, out_dtype,
                       tm=None, tf=None):
    """Grouped (block-sparse) MoE expert computation.

    x_flat : (T, H) activations (compute dtype, e.g. bf16)
    w13    : (E, 2, H, F) stacked up-proj / gate weights (pre-transposed)
    w2     : (E, F, H)    down-proj weights (pre-transposed)
    topk_idx / topk_w : (T, k) routing decisions
    Returns the (T, H) combined expert output in `out_dtype`.
    """
    T, H = x_flat.shape
    E, _, _, F = w13.shape
    k = topk_idx.shape[1]
    A = T * k                                            # assignments

    tm_t, tf_t, gran, vmem_cap = _device_defaults()
    if tm is None:
        tm = _pick_tm(A, tm_t, gran)
    if tf is None:
        tf = _pick_tf(F, tf_t)

    # ---- VMEM budget (double-buffered blocks + f32 accumulator) ------------
    xb = jnp.dtype(x_flat.dtype).itemsize
    wb = jnp.dtype(w13.dtype).itemsize
    ob = jnp.dtype(out_dtype).itemsize

    def _est(tm_, tf_):
        return (2 * (tm_ * H * xb + 3 * H * tf_ * wb + tm_ * 128 * 4
                     + tm_ * H * ob) + tm_ * H * 4)

    while _est(tm, tf) > vmem_cap:
        if tf > 128 and (tf // 2) % 128 == 0 and F % (tf // 2) == 0:
            tf //= 2
        elif tm > 16:
            tm = max(16, ((tm // 2) // 8) * 8)
        else:
            break
    vmem_limit = int(min(max(_est(tm, tf) * 5 // 4 + (4 << 20), 32 << 20),
                         vmem_cap))
    assert F % tf == 0 and tm % 8 == 0, (F, tf, tm)

    # ---- sort assignments by expert, pad each group to a multiple of tm ----
    flat_e = topk_idx.reshape(-1).astype(jnp.int32)                  # (A,)
    flat_t = jnp.repeat(jnp.arange(T, dtype=jnp.int32), k)           # (A,)
    flat_w = topk_w.reshape(-1).astype(jnp.float32)                  # (A,)
    order = jnp.argsort(flat_e)
    se, st, sw = flat_e[order], flat_t[order], flat_w[order]

    counts = jnp.bincount(flat_e, length=E).astype(jnp.int32)        # (E,)
    padded = ((counts + tm - 1) // tm) * tm                          # (E,)
    pstart = jnp.cumsum(padded) - padded
    cstart = jnp.cumsum(counts) - counts
    dest = pstart[se] + (jnp.arange(A, dtype=jnp.int32) - cstart[se])

    Tp = _round_up(A + E * (tm - 1), tm)          # static worst-case row count
    n_tiles = Tp // tm

    src_tok = jnp.full((Tp,), T, jnp.int32).at[dest].set(st)   # T -> zero row
    row_w = jnp.zeros((Tp, 1), jnp.float32).at[dest, 0].set(sw)
    x_pad = jnp.concatenate([x_flat, jnp.zeros((1, H), x_flat.dtype)], axis=0)
    x_g = x_pad[src_tok]                                        # (Tp, H) gather

    pend = jnp.cumsum(padded)
    tile_rows = jnp.arange(n_tiles, dtype=jnp.int32) * tm
    tile_gid = jnp.minimum(
        jnp.searchsorted(pend, tile_rows, side="right"), E - 1).astype(jnp.int32)
    tile_valid = (tile_rows < pend[-1]).astype(jnp.int32)

    grid = (n_tiles, F // tf)

    # Index maps: invalid (padding-overflow) tiles multiply their varying grid
    # index by valid==0 so consecutive steps repeat the same block index and
    # their DMA is skipped.
    out_padded = pl.pallas_call(
        _moe_grouped_kernel,
        out_shape=jax.ShapeDtypeStruct((Tp, H), out_dtype),
        grid_spec=pltpu.PrefetchScalarGridSpec(
            num_scalar_prefetch=2,                   # tile_gid, tile_valid
            grid=grid,
            in_specs=[
                pl.BlockSpec((tm, H),
                             lambda i, f, gid, v: (i * v[i], 0)),            # x
                pl.BlockSpec((None, 2, H, tf),
                             lambda i, f, gid, v: (gid[i], 0, 0, f * v[i])),  # w1+gate
                pl.BlockSpec((None, tf, H),
                             lambda i, f, gid, v: (gid[i], f * v[i], 0)),     # w2
                pl.BlockSpec((tm, 1),
                             lambda i, f, gid, v: (i * v[i], 0)),            # routing w
            ],
            out_specs=pl.BlockSpec((tm, H), lambda i, f, gid, v: (i, 0)),
            scratch_shapes=[pltpu.VMEM((tm, H), jnp.float32)],               # f32 acc
        ),
        compiler_params=pltpu.CompilerParams(
            dimension_semantics=("parallel", "arbitrary"),
            vmem_limit_bytes=vmem_limit,
        ),
    )(tile_gid, tile_valid, x_g, w13, w2, row_w)

    # Un-sort + top-k combine: scatter-add each assignment's output back to its
    # token row.  Padding rows are exact zeros and their sentinel index (=T) is
    # out of bounds and dropped.
    out = jnp.zeros((T, H), out_dtype).at[src_tok].add(out_padded, mode="drop")
    return out


def mixtral_sparse_moe_forward(hidden_states, params, top_k, tm=None, tf=None):
    """hidden_states: [B, S, H].  Returns (final_hidden_states, router_logits)."""
    B, S, H = hidden_states.shape
    x_flat = hidden_states.reshape(-1, H)                    # (T, H)

    # Router: tiny (T,H)x(H,E) GEMM + float32 softmax/top-k glue, left to XLA.
    router_logits = jnp.dot(x_flat.astype(jnp.float32),
                            params["router_w"].astype(jnp.float32))  # (T, E)
    routing_weights = jax.nn.softmax(router_logits, axis=-1)
    topk_w, topk_idx = jax.lax.top_k(routing_weights, top_k)          # (T, k)
    topk_w = topk_w / jnp.sum(topk_w, axis=-1, keepdims=True)
    topk_w = topk_w.astype(hidden_states.dtype)              # torch semantics

    compute_dtype = params["w13"].dtype                      # bf16 MXU path
    out_flat = moe_grouped_pallas(
        x_flat.astype(compute_dtype), params["w13"], params["w2"],
        topk_idx, topk_w.astype(jnp.float32),
        out_dtype=hidden_states.dtype, tm=tm, tf=tf)
    return out_flat.reshape(B, S, H), router_logits


# ----------------------------- params ----------------------------------------

def init_params(key, hidden_dim, widening_factor, num_experts,
                param_dtype=jnp.bfloat16):
    ffn_dim = int(hidden_dim * widening_factor)
    k0, k1, k2, k3 = jax.random.split(key, 4)

    def linear_init(k, fan_in, shape, dtype):
        bound = 1.0 / math.sqrt(fan_in)
        return jax.random.uniform(k, shape, jnp.float32, -bound, bound).astype(dtype)

    w1 = linear_init(k1, hidden_dim, (num_experts, hidden_dim, ffn_dim), param_dtype)
    gate_w = linear_init(k2, hidden_dim, (num_experts, hidden_dim, ffn_dim), param_dtype)
    return {
        # router kept in f32 (feeds a float32 softmax, tiny GEMM)
        "router_w": linear_init(k0, hidden_dim, (hidden_dim, num_experts), jnp.float32),
        # up-proj + gate stacked into one tensor -> single weight DMA stream
        "w13": jnp.stack([w1, gate_w], axis=1),              # (E, 2, H, F)
        "w2": linear_init(k3, ffn_dim, (num_experts, ffn_dim, hidden_dim), param_dtype),
    }


# ----------------------------- reference (for sanity check) ------------------

def _moe_reference(hidden_states, params, top_k):
    B, S, H = hidden_states.shape
    x_flat = hidden_states.reshape(-1, H)
    E = params["router_w"].shape[1]
    router_logits = jnp.dot(x_flat.astype(jnp.float32), params["router_w"])
    rw = jax.nn.softmax(router_logits, axis=-1)
    topk_w, topk_idx = jax.lax.top_k(rw, top_k)
    topk_w = topk_w / jnp.sum(topk_w, axis=-1, keepdims=True)
    one_hot = jax.nn.one_hot(topk_idx, E, dtype=jnp.float32)
    rw_dense = jnp.sum(one_hot * topk_w[..., None], axis=1)
    w1, gate_w, w2 = params["w13"][:, 0], params["w13"][:, 1], params["w2"]
    xc = x_flat.astype(w1.dtype)
    out = jnp.zeros((x_flat.shape[0], H), jnp.float32)
    for e in range(E):
        h1 = jnp.dot(xc, w1[e], preferred_element_type=jnp.float32)
        hg = jnp.dot(xc, gate_w[e], preferred_element_type=jnp.float32)
        h = (jax.nn.silu(h1) * hg).astype(w2.dtype)
        y = jnp.dot(h, w2[e], preferred_element_type=jnp.float32)
        out = out + rw_dense[:, e:e + 1] * y
    return out.reshape(B, S, H).astype(hidden_states.dtype), router_logits


# ----------------------------- main -------------------------------------------

if __name__ == "__main__":
    # small config: batch=2, seq=8, hidden=32, widening=8 (F=256), experts=4, top_k=2
    B, S, H = 2, 8, 32
    WIDENING = 8
    NUM_EXPERTS = 4
    TOP_K = 2

    key = jax.random.PRNGKey(0)
    k_params, k_x = jax.random.split(key)
    params = init_params(k_params, H, WIDENING, NUM_EXPERTS)
    x = jax.random.normal(k_x, (B, S, H), dtype=jnp.float32)

    # force multiple assignment tiles and multiple F tiles (F=256 -> 2) in the test
    fwd = jax.jit(functools.partial(mixtral_sparse_moe_forward,
                                    top_k=TOP_K, tm=8, tf=128))
    final_hidden_states, router_logits = fwd(x, params)
    jax.block_until_ready((final_hidden_states, router_logits))

    assert final_hidden_states.shape == (B, S, H)
    assert router_logits.shape == (B * S, NUM_EXPERTS)

    ref_out, ref_logits = _moe_reference(x, params, TOP_K)
    assert jnp.allclose(router_logits, ref_logits, atol=1e-5, rtol=1e-5), \
        "router logits mismatch"
    assert jnp.allclose(final_hidden_states, ref_out, atol=2e-2, rtol=2e-2), \
        f"max diff {jnp.max(jnp.abs(final_hidden_states - ref_out))}"

    print("KERNEL_OK")
</pallas_src>

<mosaic_0001>
module attributes {stable_mosaic.version = 11 : i64} {
  func.func private @main(%arg0: i32) attributes {dimension_semantics = [#tpu.dimension_semantics<core_parallel>], iteration_bounds = array<i64: 2>, tpu.core_type = #tpu.core_type<sc_scalar_subcore>, window_params = []} {
    return
  }
}

module attributes {stable_mosaic.version = 11 : i64} {
  func.func private @main(%arg0: i32) attributes {dimension_semantics = [#tpu.dimension_semantics<core_parallel>], iteration_bounds = array<i64: 2>, tpu.core_type = #tpu.core_type<sc_scalar_subcore>, window_params = []} {
    return
  }
}

module attributes {stable_mosaic.version = 11 : i64} {
  func.func @_moe_grouped_kernel(%arg0: i32, %arg1: i32, %arg2: memref<8xi32, #tpu.memory_space<smem>>, %arg3: memref<8xi32, #tpu.memory_space<smem>>, %arg4: memref<8x32xbf16, #tpu.memory_space<vmem>>, %arg5: memref<1x2x32x128xbf16, #tpu.memory_space<vmem>>, %arg6: memref<1x128x32xbf16, #tpu.memory_space<vmem>>, %arg7: memref<8x1xf32, #tpu.memory_space<vmem>>, %arg8: memref<8x32xf32, #tpu.memory_space<vmem>>, %arg9: memref<8x32xf32, #tpu.memory_space<vmem>>) attributes {dimension_semantics = [#tpu.dimension_semantics<parallel>, #tpu.dimension_semantics<arbitrary>], iteration_bounds = array<i64: 8, 2>, scalar_prefetch = 2 : i64, scratch_operands = 1 : i64, tpu.core_type = #tpu.core_type<tc>, window_params = [{transform_indices = @transform_0, window_bounds = array<i64: 8, 32>}, {transform_indices = @transform_1, window_bounds = array<i64: 1, 2, 32, 128>}, {transform_indices = @transform_2, window_bounds = array<i64: 1, 128, 32>}, {transform_indices = @transform_3, window_bounds = array<i64: 8, 1>}, {transform_indices = @transform_4, window_bounds = array<i64: 8, 32>}]} {
    %c0_i32 = arith.constant 0 : i32
    %0 = arith.cmpi eq, %arg1, %c0_i32 : i32
    %1 = arith.extui %0 : i1 to i32
    %c0_i32_0 = arith.constant 0 : i32
    %2 = arith.cmpi ne, %1, %c0_i32_0 : i32
    scf.if %2 {
      %cst = arith.constant 0.000000e+00 : f32
      %11 = vector.broadcast %cst : f32 to vector<8x32xf32>
      %c0 = arith.constant 0 : index
      %c0_4 = arith.constant 0 : index
      %12 = vector.load %arg9[%c0, %c0_4] : memref<8x32xf32, #tpu.memory_space<vmem>>, vector<8x32xf32>
      tpu.vector_store %arg9[%c0, %c0_4], %11 {strides = array<i32>} : memref<8x32xf32, #tpu.memory_space<vmem>>, vector<8x32xf32>,
    } else {
    }
    %3 = arith.index_cast %arg0 : i32 to index
    %4 = memref.load %arg3[%3] : memref<8xi32, #tpu.memory_space<smem>>
    %c0_i32_1 = arith.constant 0 : i32
    %5 = arith.cmpi sgt, %4, %c0_i32_1 : i32
    %6 = arith.extui %5 : i1 to i32
    %c0_i32_2 = arith.constant 0 : i32
    %7 = arith.cmpi ne, %6, %c0_i32_2 : i32
    scf.if %7 {
      %c0 = arith.constant 0 : index
      %c0_4 = arith.constant 0 : index
      %11 = vector.load %arg4[%c0, %c0_4] : memref<8x32xbf16, #tpu.memory_space<vmem>>, vector<8x32xbf16>
      %c0_5 = arith.constant 0 : index
      %c0_6 = arith.constant 0 : index
      %c0_7 = arith.constant 0 : index
      %c0_8 = arith.constant 0 : index
      %12 = vector.load %arg5[%c0_5, %c0_6, %c0_7, %c0_8] : memref<1x2x32x128xbf16, #tpu.memory_space<vmem>>, vector<1x1x32x128xbf16>
      %13 = vector.shape_cast %12 : vector<1x1x32x128xbf16> to vector<32x128xbf16>
      %cst = arith.constant dense<0.000000e+00> : vector<8x128xf32>
      %14 = tpu.matmul %11, %13, %cst {dimension_numbers = #tpu.dot_dimension_numbers<[1], [0], [0], [1], [0, 0, 1, 1], [], []>} : vector<8x32xbf16>, vector<32x128xbf16>, vector<8x128xf32> -> vector<8x128xf32>
      %c0_9 = arith.constant 0 : index
      %c1 = arith.constant 1 : index
      %c0_10 = arith.constant 0 : index
      %c0_11 = arith.constant 0 : index
      %15 = vector.load %arg5[%c0_9, %c1, %c0_10, %c0_11] : memref<1x2x32x128xbf16, #tpu.memory_space<vmem>>, vector<1x1x32x128xbf16>
      %16 = vector.shape_cast %15 : vector<1x1x32x128xbf16> to vector<32x128xbf16>
      %cst_12 = arith.constant dense<0.000000e+00> : vector<8x128xf32>
      %17 = tpu.matmul %11, %16, %cst_12 {dimension_numbers = #tpu.dot_dimension_numbers<[1], [0], [0], [1], [0, 0, 1, 1], [], []>} : vector<8x32xbf16>, vector<32x128xbf16>, vector<8x128xf32> -> vector<8x128xf32>
      %18 = arith.negf %14 : vector<8x128xf32>
      %19 = math.exp %18 : vector<8x128xf32>
      %cst_13 = arith.constant 1.000000e+00 : f32
      %20 = vector.broadcast %cst_13 : f32 to vector<8x128xf32>
      %21 = arith.addf %20, %19 : vector<8x128xf32>
      %22 = arith.divf %20, %21 : vector<8x128xf32>
      %23 = arith.mulf %14, %22 : vector<8x128xf32>
      %24 = arith.mulf %23, %17 : vector<8x128xf32>
      %c0_14 = arith.constant 0 : index
      %c0_15 = arith.constant 0 : index
      %25 = vector.load %arg7[%c0_14, %c0_15] : memref<8x1xf32, #tpu.memory_space<vmem>>, vector<8x1xf32>
      %26 = vector.broadcast %25 : vector<8x1xf32> to vector<8x128xf32>
      %27 = arith.mulf %24, %26 : vector<8x128xf32>
      %28 = arith.truncf %27 : vector<8x128xf32> to vector<8x128xbf16>
      %c0_16 = arith.constant 0 : index
      %c0_17 = arith.constant 0 : index
      %29 = vector.load %arg9[%c0_16, %c0_17] : memref<8x32xf32, #tpu.memory_space<vmem>>, vector<8x32xf32>
      %c0_18 = arith.constant 0 : index
      %c0_19 = arith.constant 0 : index
      %c0_20 = arith.constant 0 : index
      %30 = vector.load %arg6[%c0_18, %c0_19, %c0_20] : memref<1x128x32xbf16, #tpu.memory_space<vmem>>, vector<1x128x32xbf16>
      %31 = vector.shape_cast %30 : vector<1x128x32xbf16> to vector<128x32xbf16>
      %cst_21 = arith.constant dense<0.000000e+00> : vector<8x32xf32>
      %32 = tpu.matmul %28, %31, %cst_21 {dimension_numbers = #tpu.dot_dimension_numbers<[1], [0], [0], [1], [0, 0, 1, 1], [], []>} : vector<8x128xbf16>, vector<128x32xbf16>, vector<8x32xf32> -> vector<8x32xf32>
      %33 = arith.addf %29, %32 : vector<8x32xf32>
      %c0_22 = arith.constant 0 : index
      %c0_23 = arith.constant 0 : index
      %34 = vector.load %arg9[%c0_22, %c0_23] : memref<8x32xf32, #tpu.memory_space<vmem>>, vector<8x32xf32>
      tpu.vector_store %arg9[%c0_22, %c0_23], %33 {strides = array<i32>} : memref<8x32xf32, #tpu.memory_space<vmem>>, vector<8x32xf32>,
    } else {
    }
    %c1_i32 = arith.constant 1 : i32
    %8 = arith.cmpi eq, %arg1, %c1_i32 : i32
    %9 = arith.extui %8 : i1 to i32
    %c0_i32_3 = arith.constant 0 : i32
    %10 = arith.cmpi ne, %9, %c0_i32_3 : i32
    scf.if %10 {
      %c0 = arith.constant 0 : index
      %c0_4 = arith.constant 0 : index
      %11 = vector.load %arg9[%c0, %c0_4] : memref<8x32xf32, #tpu.memory_space<vmem>>, vector<8x32xf32>
      %c0_5 = arith.constant 0 : index
      %c0_6 = arith.constant 0 : index
      %12 = vector.load %arg8[%c0_5, %c0_6] : memref<8x32xf32, #tpu.memory_space<vmem>>, vector<8x32xf32>
      tpu.vector_store %arg8[%c0_5, %c0_6], %11 {strides = array<i32>} : memref<8x32xf32, #tpu.memory_space<vmem>>, vector<8x32xf32>,
    } else {
    }
    return
  }
  func.func @transform_0(%arg0: i32, %arg1: i32, %arg2: memref<8xi32, #tpu.memory_space<smem>>, %arg3: memref<8xi32, #tpu.memory_space<smem>>) -> (i32, i32) {
    %0 = arith.index_cast %arg0 : i32 to index
    %1 = memref.load %arg3[%0] : memref<8xi32, #tpu.memory_space<smem>>
    %2 = arith.muli %arg0, %1 : i32
    %c0_i32 = arith.constant 0 : i32
    %c0_i32_0 = arith.constant 0 : i32
    return %2, %c0_i32 : i32, i32
  }
  func.func @transform_1(%arg0: i32, %arg1: i32, %arg2: memref<8xi32, #tpu.memory_space<smem>>, %arg3: memref<8xi32, #tpu.memory_space<smem>>) -> (i32, i32, i32, i32) {
    %0 = arith.index_cast %arg0 : i32 to index
    %1 = memref.load %arg2[%0] : memref<8xi32, #tpu.memory_space<smem>>
    %2 = arith.index_cast %arg0 : i32 to index
    %3 = memref.load %arg3[%2] : memref<8xi32, #tpu.memory_space<smem>>
    %4 = arith.muli %arg1, %3 : i32
    %c0_i32 = arith.constant 0 : i32
    %c0_i32_0 = arith.constant 0 : i32
    %c0_i32_1 = arith.constant 0 : i32
    return %1, %c0_i32, %c0_i32_0, %4 : i32, i32, i32, i32
  }
  func.func @transform_2(%arg0: i32, %arg1: i32, %arg2: memref<8xi32, #tpu.memory_space<smem>>, %arg3: memref<8xi32, #tpu.memory_space<smem>>) -> (i32, i32, i32) {
    %0 = arith.index_cast %arg0 : i32 to index
    %1 = memref.load %arg2[%0] : memref<8xi32, #tpu.memory_space<smem>>
    %2 = arith.index_cast %arg0 : i32 to index
    %3 = memref.load %arg3[%2] : memref<8xi32, #tpu.memory_space<smem>>
    %4 = arith.muli %arg1, %3 : i32
    %c0_i32 = arith.constant 0 : i32
    %c0_i32_0 = arith.constant 0 : i32
    return %1, %4, %c0_i32 : i32, i32, i32
  }
  func.func @transform_3(%arg0: i32, %arg1: i32, %arg2: memref<8xi32, #tpu.memory_space<smem>>, %arg3: memref<8xi32, #tpu.memory_space<smem>>) -> (i32, i32) {
    %0 = arith.index_cast %arg0 : i32 to index
    %1 = memref.load %arg3[%0] : memref<8xi32, #tpu.memory_space<smem>>
    %2 = arith.muli %arg0, %1 : i32
    %c0_i32 = arith.constant 0 : i32
    %c0_i32_0 = arith.constant 0 : i32
    return %2, %c0_i32 : i32, i32
  }
  func.func @transform_4(%arg0: i32, %arg1: i32, %arg2: memref<8xi32, #tpu.memory_space<smem>>, %arg3: memref<8xi32, #tpu.memory_space<smem>>) -> (i32, i32) {
    %c0_i32 = arith.constant 0 : i32
    %c0_i32_0 = arith.constant 0 : i32
    return %arg0, %c0_i32 : i32, i32
  }
}

</mosaic_0001>

<bundles_post_ra>
// kernel: custom-call.1
= control target key start
LH: loop header
LB: loop body
LE: loop exit
PB: predicated region body
PF: predicated region fallthrough
CT: control target
= control target key end

     0   :  { %s6_s0 = inlined_call_operand.vmem [shape: u32[8], index: 0, kind: output, shape index: {}]  }

// kernel: mixtral_sparse_moe_forward.1
= control target key start
LH: loop header
LB: loop body
LE: loop exit
PB: predicated region body
PF: predicated region fallthrough
CT: control target
= control target key end

     0   :  { %s1243_s0 = inlined_call_operand.vmem [shape: s32[8], index: 0, kind: input, shape index: {}]   ;;  %s1244_s2 = inlined_call_operand.vmem [shape: bf16[64,32], index: 2, kind: input, shape index: {}]   ;;  %s1245_s3 = inlined_call_operand.vmem [shape: bf16[4,2,32,256], index: 3, kind: input, shape index: {}]   ;;  %s1246_s4 = inlined_call_operand.vmem [shape: bf16[4,256,32], index: 4, kind: input, shape index: {}]   ;;  %s1247_s5 = inlined_call_operand.vmem [shape: f32[64,1], index: 5, kind: input, shape index: {}]   ;;  %s1248_s6 = inlined_call_operand.vmem [shape: f32[64,32], index: 6, kind: output, shape index: {}]   ;;  %s1249_s1 = inlined_call_operand.vmem [shape: s32[8], index: 1, kind: input, shape index: {}]  }
   0x1   :  { %1251 = sst [smem:[#allocation9_spill]] %s1245_s3  ;;  %s11_s23 = sshll.u32 %s1243_s0, 4  ;;  %s12_s23 = int_to_ptr.vmem [resolvable:$true] %s11_s23 }
   0x2   :  { %s15_s26 = sshll.u32 %s1249_s1, 4  ;;  %s969_s27 = scalar_lea.vmem %s12_s23, 16  ;;  %s16_s26 = int_to_ptr.vmem [resolvable:$true] %s15_s26 }
   0x3   :  { %p970_p0 = scmp.ne.s32.totalorder %s12_s23, %s969_s27  ;;  %p974_p1 = scmp.lt.s32.totalorder %s12_s23, %s12_s23 }
   0x4   :  { %p975_p2 = scmp.lt.s32.totalorder %s969_s27, %s969_s27 }
   0x6   :  { %p976_p3 = por %p975_p2, %p974_p1 }
   0x8   :  { %p977_p4 = pnand %p976_p3, %p970_p0 }
   0xa   :  { %980 = shalt.err (!%p977_p4)  }
   0xb   :  { %s1051_s28 = smov [#allocation4]   ;;  %s981_s29 = scalar_lea.vmem %s16_s26, 16 }
   0xc   :  { %14 = dma.vmem_to_smem %s12_s23, 16, %s1051_s28, [#allocation3] }
   0xd   :  { %p982_p5 = scmp.ne.s32.totalorder %s16_s26, %s981_s29  ;;  %p986_p6 = scmp.lt.s32.totalorder %s16_s26, %s16_s26 }
   0xe   :  { %p987_p7 = scmp.lt.s32.totalorder %s981_s29, %s981_s29 }
  0x10   :  { %p988_p8 = por %p987_p7, %p986_p6 }
  0x12   :  { %p989_p9 = pnand %p988_p8, %p982_p5 }
  0x14   :  { %992 = shalt.err (!%p989_p9)  }
  0x15   :  { %s1052_s0 = smov [#allocation5]  }
  0x16   :  { %18 = dma.vmem_to_smem %s16_s26, 16, %s1052_s0, [#allocation3] }
  0x17   :  { %1021 = dma.done.wait [#allocation3], 32 }
  0x18   :  { %1022 = vsyncadd [#allocation3], 4294967264 }
  0x19   :  { %20 = sfence }
  0x1a   :  { %s1098_s1 = smov 0   ;;  %s1100_s30 = smov 0  }
  0x1b   :  { %s1102_s7 = smov 0   ;;  %s1104_s8 = smov 0  }
  0x1c   :  { %s1106_s9 = smov 0   ;;  %s1108_s10 = smov 0  }
  0x1d   :  { %s1110_s11 = smov 0  }
  0x1e LB: > { %s35_s12 = sadd.s32 1, %s1041_s9  ;;  %s38_s13 = sadd.s32 1, %s1045_s10  ;;  %s1049_s11 = sphi %s1110_s11, %s26_s11   ;;  %s1045_s10 = sphi %s1108_s10, %s1261_s10   ;;  %s1041_s9 = sphi %s1106_s9, %s1260_s9   ;;  %s1037_s8 = sphi %s1104_s8, %s1259_s8   ;;  %s1033_s7 = sphi %s1102_s7, %s1258_s7   ;;  %s1029_s30 = sphi %s1100_s30, %s1257_s30   ;;  %s1025_s1 = sphi %s1098_s1, %s1256_s1  }
  0x1f   : > { %p36_p10 = scmp.ge.s32.totalorder %s35_s12, 2  ;;  %p90_p11 = scmp.ne.s32.totalorder %s1029_s30, %s1025_s1 }
  0x20   : > { %p91_p12 = scmp.eq.s32.totalorder %s1049_s11, 0  ;;  %s73_s14 = sld [smem:[#allocation5 + %s1045_s10]] }
  0x21   : > { %s1263_s13 = smov (!%p36_p10, %s38_s13), %s1045_s10  ;;  %s72_s16 = sld [smem:[#allocation4 + %s1045_s10]] }
  0x22   : > { %p40_p13 = scmp.ge.s32.totalorder %s1263_s13, 8  ;;  %p1140_p0 = por %p91_p12, %p90_p11 }
  0x23   : > { %s1267_s12 = smov (%p36_p10, %s35_s12), 0  ;;  %s83_s24 = sadd.s32 1, %s1029_s30 }
  0x24   : > { %s1265_s13 = smov (%p40_p13, %s1263_s13), 0  ;;  %p803_p2 = scmp.ge.s32.totalorder %s1049_s11, 16 }
  0x25   : > { %1253 = sst [smem:[#allocation8_spill]] %s1265_s13 }
  0x26   : > { %s75_s17 = sld [smem:[#allocation4 + %s1265_s13]]  ;;  %s74_s19 = smul.u32 %s1041_s9, %s73_s14 }
  0x27   : > { %s76_s18 = sld [smem:[#allocation5 + %s1265_s13]] }
  0x2c   : > { %s78_s21 = ssub.s32 %s72_s16, %s75_s17 }
  0x2d   : > { %s77_s20 = smul.u32 %s76_s18, %s1267_s12 }
  0x2f   : > { %s79_s22 = ssub.s32 %s74_s19, %s77_s20  ;;  %206 = sbr.rel (%p803_p2) target bundleno = 70 (0x46), region = 16 }
  0x30   : > { %s80_s23 = sor.u32 %s79_s22, %s78_s21 }
  0x31   : > { %p81_p1 = scmp.eq.s32.totalorder %s80_s23, 0 }
  0x33   : > { %s1155_s25 = scalar_select %p81_p1, %s1029_s30, %s83_s24  }
  0x34   : > { %220 = sbr.rel (!%p1140_p0) target bundleno = 70 (0x46), region = 24  ;;  %s225_s26 = sld [smem:[#allocation4 + %s1045_s10]] (%p1140_p0) }
  0x35   : > { %s226_s27 = sld [smem:[#allocation5 + %s1045_s10]] (%p1140_p0)  ;;  %s222_s28 = sand.u32 (%p1140_p0), 1, %s1029_s30  }
  0x36   : > { %s804_s0 = sshll.u32 (%p1140_p0), %s222_s28, 5  ;;  %s1254_s3 = sld [smem:[#allocation9_spill]] (%p1140_p0) }
  0x37   : > { %s224_s15 = scalar_lea.vmem (%p1140_p0), [#allocation6], %s804_s0 }
  0x3a   : > { %s805_s29 = sshll.u32 %s225_s26, 4 }
  0x3b   : > { %s227_s14 = smul.u32 %s1041_s9, %s226_s27 }
  0x3d   : > { %s229_s16 = sadd.s32 %s805_s29, %s227_s14 }
  0x3e   : > { %s806_s17 = sshll.u32 %s229_s16, 2 }
  0x3f   : > { %s231_s20 = scalar_lea.vmem %s1254_s3, %s806_s17 }
  0x40   : > { %v248_v0 = vld [vmem:[%s231_s20] sm:$0xf]  ;;  %v250_v1 = vld [vmem:[%s231_s20 + $0x8] sm:$0xf]  ;;  %v252_v2 = vld [vmem:[%s231_s20 + $0x10] sm:$0xf] }
  0x41   : > { %249 = vst [vmem:[%s224_s15] sm:$0xf] %v248_v0  ;;  %251 = vst [vmem:[%s224_s15 + $0x4] sm:$0xf] %v250_v1  ;;  %v254_v3 = vld [vmem:[%s231_s20 + $0x18] sm:$0xf] }
  0x42   : > { %253 = vst [vmem:[%s224_s15 + $0x8] sm:$0xf] %v252_v2  ;;  %v256_v4 = vld [vmem:[%s231_s20 + $0x20] sm:$0xf]  ;;  %v258_v5 = vld [vmem:[%s231_s20 + $0x28] sm:$0xf] }
  0x43   : > { %255 = vst [vmem:[%s224_s15 + $0xc] sm:$0xf] %v254_v3  ;;  %257 = vst [vmem:[%s224_s15 + $0x10] sm:$0xf] %v256_v4  ;;  %v260_v6 = vld [vmem:[%s231_s20 + $0x30] sm:$0xf] }
  0x44   : > { %259 = vst [vmem:[%s224_s15 + $0x14] sm:$0xf] %v258_v5  ;;  %v262_v7 = vld [vmem:[%s231_s20 + $0x38] sm:$0xf]  ;;  %261 = vst [vmem:[%s224_s15 + $0x18] sm:$0xf] %v260_v6 }
  0x45   : > { %263 = vst [vmem:[%s224_s15 + $0x1c] sm:$0xf] %v262_v7 }
  0x46 PF: > { %p807_p3 = scmp.ge.s32.totalorder %s1049_s11, 1  ;;  %p332_p4 = scmp.lt.s32.totalorder %s1049_s11, 17 }
  0x48   : > { %p333_p5 = pnand %p807_p3, %p332_p4 }
  0x49   : > { %s339_s21 = sand.u32 (!%p333_p5), 1, %s1025_s1   ;;  %s387_s22 = sld [smem:[#allocation5 + %s1037_s8]] (!%p333_p5) }
  0x4a   : > { %336 = sbr.rel (%p333_p5) target bundleno = 558 (0x22e), region = 73  ;;  %s808_s23 = sshll.u32 (!%p333_p5), %s339_s21, 5 }
  0x4b   : > { %s398_s24 = sld [smem:[#allocation4 + %s1037_s8]] (!%p333_p5)  ;;  %p422_p6 = scmp.lt.s32.totalorder (!%p333_p5), %s1037_s8, 7 }
  0x4c   : > { %s399_s26 = sld [smem:[#allocation5 + %s1037_s8]] (!%p333_p5)  ;;  %s1197_s19 = scalar_lea.vmem (!%p333_p5), [#allocation6], %s808_s23 }
  0x4d   : > { %s414_s27 = sld [smem:[#allocation5 + %s1037_s8]] (!%p333_p5)  ;;  %p815_p11 = scmp.ne.s32.totalorder (!%p333_p5), %s1033_s7, 0 }
  0x4f   : > { %s423_s28 = scalar_select %p422_p6, %s1037_s8, 7 }
  0x50   : > { %s388_s29 = smul.u32 %s1037_s8, %s387_s22 }
  0x51   : > { %p402_p7 = scmp.lt.s32.totalorder %s398_s24, 3  ;;  %s814_s0 = sshll.u32 %s423_s28, 3 }
  0x52   : > { %p389_p8 = scmp.lt.s32.totalorder %s388_s29, 7  ;;  %s400_s14 = smul.u32 %s1033_s7, %s399_s26 }
  0x53   : > { %s1269_s24 = smov (!%p402_p7, %s398_s24), 3  ;;  %s415_s15 = smul.u32 %s1037_s8, %s414_s27 }
  0x54   : > { %s1271_s29 = smov (!%p389_p8, %s388_s29), 7  ;;  %s810_s16 = sshll.u32 %s400_s14, 4 }
  0x55   : > { %s811_s17 = sshll.u32 %s1269_s24, 5  ;;  %s809_s18 = sshll.u32 %s1271_s29, 2 }
  0x56   : > { %p404_p9 = scmp.lt.s32.totalorder %s810_s16, 31  ;;  %s1181_s20 = scalar_lea.vmem %s1244_s2, %s809_s18 }
  0x57   : > { %p416_p10 = scmp.lt.s32.totalorder %s415_s15, 7  ;;  %s1187_s28 = scalar_lea.vmem %s1248_s6, %s814_s0 }
  0x58   : > { %s1273_s16 = smov (!%p404_p9, %s810_s16), 31  ;;  %430 = sbr.rel (%p815_p11) target bundleno = 95 (0x5f), region = 81 }
  0x59   : > { %s407_s26 = sadd.s32 %s811_s17, %s1273_s16  ;;  %s1275_s15 = smov (!%p416_p10, %s415_s15), 7 }
  0x5a   : > { %s812_s3 = sshll.u32 %s407_s26, 2  ;;  %s813_s29 = sshll.u32 %s1275_s15, 3 }
  0x5b   : > { %s1192_s24 = scalar_lea.vmem %s1246_s4, %s812_s3  ;;  %s419_s27 = scalar_lea.vmem %s1247_s5, %s813_s29 }
  0x5d   : > { %vm431_vm0 = vcmask 261120   ;;  %v1053_v8 = vmov 0.0  }
  0x5e   : > { %432 = vst.msk [vmem:[#allocation2] sm:$0xff] %vm431_vm0, %v1053_v8 }
  0x5f PF: > { %s433_s0 = sld [smem:[#allocation5 + %s1037_s8]] }
  0x65   : > { %p816_p12 = scmp.le.s32.totalorder %s433_s0, 0 }
  0x67   : > { %437 = sbr.rel (%p816_p12) target bundleno = 549 (0x225), region = 85 }
  0x6c   : > { %v953_v9 = vld [vmem:[%s1197_s19 + $0x8] sm:$0xff]   ;;  %v1054_v10 = vmov 0.0   ;;  %v954_v11 = vld [vmem:[%s1197_s19] sm:$0xff]   ;;  %vm1055_vm1 = vmmov 0   ;;  %v438_v12 = vld [vmem:[%s1181_s20] sm:$0xf] }
  0x6d   : > { %854 = vmatprep.subr.bf16.mxu1 %v1054_v10  ;;  %870 = vmatprep.subr.bf16.mxu0 %v1054_v10  ;;  %vm455_vm2 = vcmask 261120   ;;  %v955_v13 = vld [vmem:[%s1197_s19 + $0x18] sm:$0xff]   ;;  %v1056_v15 = vmov 0   ;;  %v956_v16 = vld [vmem:[%s1197_s19 + $0x10] sm:$0xff]   ;;  %v958_v18 = vld [vmem:[%s1192_s24 + $0x30] sm:$0xff]  }
  0x6e   : > { %855 = vmatpush3.bf16.msra.mxu1 %v953_v9  ;;  %858 = vmatprep.mubr.msk.bf16.mxu1 %vm1055_vm1, %v1054_v10  ;;  %v564_v14 = vld [vmem:[%s419_s27] sm:$0xff]  ;;  %v957_v17 = vld [vmem:[%s1192_s24 + $0x38] sm:$0xff]   ;;  %v959_v19 = vld [vmem:[%s1192_s24 + $0x28] sm:$0xff]  }
  0x6f   : > { %856 = vmatprep.subr.bf16.mxu1 %v1054_v10  ;;  %886 = vmatprep.mubr.msk.bf16.mxu0 %vm1055_vm1, %v1054_v10  ;;  %v960_v20 = vld [vmem:[%s1192_s24 + $0x20] sm:$0xff]   ;;  %v961_v21 = vld [vmem:[%s1192_s24 + $0x18] sm:$0xff]   ;;  %v962_v22 = vld [vmem:[%s1192_s24 + $0x10] sm:$0xff]  }
  0x70   : > { %952 = vset.pattern.permute.xlu0 %v1056_v15  ;;  %871 = vmatpush3.bf16.msra.mxu0 %v957_v17  ;;  %v963_v23 = vld [vmem:[%s1192_s24 + $0x8] sm:$0xff]   ;;  %v964_v24 = vld [vmem:[%s1192_s24] sm:$0xff]  }
  0x71   : > { %567 = vperm.xlu0 %952, %v564_v14   ;;  %872 = vmatprep.subr.bf16.mxu0 %v1054_v10  ;;  %v572_v42 = vld [vmem:[#allocation2] sm:$0xff] }
  0x72   : > { %857 = vmatpush3.bf16.msra.mxu1 %v954_v11 }
  0x73   : > { %862 = vmatprep.subr.bf16.mxu1 %v1054_v10 }
  0x74   : > { %873 = vmatpush3.bf16.msra.mxu0 %v958_v18 }
  0x75   : > { %859 = vmatmul.mubr.msk.bf16.vlgmr.msra.gmra.mxu1 %vm455_vm2, %v438_v12  ;;  %874 = vmatprep.subr.bf16.mxu0 %v1054_v10 }
  0x76   : > { %863 = vmatpush3.bf16.msra.mxu1 %v955_v13  ;;  %866 = vmatprep.mubr.msk.bf16.mxu1 %vm1055_vm1, %v1054_v10 }
  0x77   : > { %864 = vmatprep.subr.bf16.mxu1 %v1054_v10 }
  0x78   : > { %875 = vmatpush3.bf16.msra.mxu0 %v959_v19 }
  0x79   : > { %876 = vmatprep.subr.bf16.mxu0 %v1054_v10 }
  0x7a   : > { %865 = vmatpush3.bf16.msra.mxu1 %v956_v16 }
  0x7c   : > { %877 = vmatpush3.bf16.msra.mxu0 %v960_v20 }
  0x7d   : > { %867 = vmatmul.mubr.msk.bf16.vlgmr.msra.gmra.mxu1 %vm455_vm2, %v438_v12  ;;  %878 = vmatprep.subr.bf16.mxu0 %v1054_v10 }
  0x80   : > { %879 = vmatpush3.bf16.msra.mxu0 %v961_v21 }
  0x81   : > { %880 = vmatprep.subr.bf16.mxu0 %v1054_v10 }
  0x84   : > { %881 = vmatpush3.bf16.msra.mxu0 %v962_v22 }
  0x85   : > { %882 = vmatprep.subr.bf16.mxu0 %v1054_v10 }
  0x88   : > { %883 = vmatpush3.bf16.msra.mxu0 %v963_v23 }
  0x89   : > { %884 = vmatprep.subr.bf16.mxu0 %v1054_v10 }
  0x8c   : > { %885 = vmatpush3.bf16.msra.mxu0 %v964_v24 }
  0xec   : > { %v568_v38 = vpop.permute.xlu0 %567 }
 0x135   : > { %v493_v25 = vpop.f32.mrf.mxu1 }
 0x136   : > { %v827_v26 = vmul.f32 -1.442695, %v493_v25 }
 0x137   : > { %v860_v27 = vpop.f32.mrf.mxu1 }
 0x138   : > { %965 = vpow2.f32 %v827_v26 }
 0x139   : > { %v496_v28 = vpop.f32.mrf.mxu1 }
 0x13b   : > { %v861_v29 = vpop.f32.mrf.mxu1 }
 0x13d   : > { %v550_v30 = vpop.f32.mrf.mxu1 }
 0x13f   : > { %v868_v31 = vpop.f32.mrf.mxu1 }
 0x141   : > { %v553_v32 = vpop.f32.mrf.mxu1 }
 0x143   : > { %v869_v33 = vpop.f32.mrf.mxu1 }
 0x145   : > { %v966_v34 = vpop.eup %965 }
 0x146   : > { %v559_v35 = vadd.f32 1.0, %v966_v34 }
 0x148   : > { %967 = vrcp.f32 %v559_v35 }
 0x155   : > { %v968_v36 = vpop.eup %967 }
 0x156   : > { %v562_v37 = vmul.f32 %v968_v36, %v493_v25 }
 0x158   : > { %v563_v39 = vmul.f32 %v562_v37, %v550_v30 }
 0x15a   : > { %v570_v40 = vmul.f32 %v568_v38, %v563_v39 }
 0x15c   : > { %v571_v41 = vpack.c.bf16 %v570_v40, %v570_v40 }
 0x15e   : > { %887 = vmatmul.mubr.bf16.vlgmr.msra.gmra.mxu0 %v571_v41 }
 0x21e   : > { %v671_v43 = vpop.f32.mrf.mxu0 }
 0x21f   : > { %v677_v44 = vadd.f32 %v671_v43, %v572_v42 }
 0x220   : > { %v888_v45 = vpop.f32.mrf.mxu0 }
 0x221   : > { %678 = vst.msk [vmem:[#allocation2] sm:$0xff] %vm455_vm2, %v677_v44 }
 0x222   : > { %v674_v46 = vpop.f32.mrf.mxu0 }
 0x224   : > { %v889_v47 = vpop.f32.mrf.mxu0 }
 0x225 PF: > { %p836_p13 = scmp.ne.s32.totalorder %s1033_s7, 1 }
 0x227   : > { %682 = sbr.rel (%p836_p13) target bundleno = 558 (0x22e), region = 89 }
 0x22c   : > { %v683_v48 = vld [vmem:[#allocation2] sm:$0xff]  ;;  %vm684_vm3 = vcmask 261120  }
 0x22d   : > { %685 = vst.msk [vmem:[%s1187_s28] sm:$0xff] %vm684_vm3, %v683_v48 }
 0x22e PF: > { %s26_s11 = sadd.s32 1, %s1049_s11   ;;  %s1255_s3 = sld [smem:[#allocation8_spill]] }
 0x22f   : > { %p23_p0 = scmp.ge.s32.totalorder %s26_s11, 18   ;;  %s1256_s1 = smov %s1029_s30 }
 0x230   : > { %s1257_s30 = smov %s1155_s25  ;;  %s1258_s7 = smov %s1041_s9 }
 0x231   : > { %s1259_s8 = smov %s1045_s10  ;;  %s1260_s9 = smov %s1267_s12 }
 0x232   :  { %25 = sbr.rel (!%p23_p0) target bundleno = 30 (0x1e), region = 134 }
 0x234   : > { %s1261_s10 = smov %s1255_s3 }

</bundles_post_ra>
